<compile_context>
chip_gen: v5e
topology: v5e:2x2
jax: 0.10.0
libtpu: 0.0.40
codegen_flags: <defaults>
</compile_context>

<pallas_src>
import functools
import math

import jax
import jax.numpy as jnp
from jax import lax
from jax.experimental import pallas as pl
from jax.experimental.pallas import tpu as pltpu


N_COMPONENTS = 5                       # "5-components" model fits
VMEM_BUDGET_BYTES = 32 * 1024 * 1024   # double-buffered stream budget (all gens)


def _round_up(v, m):
    return ((v + m - 1) // m) * m


def _sublane_pad(rows, itemsize):
    packing = max(1, 4 // max(1, itemsize))
    return _round_up(max(rows, 1), 8 * packing)


def _num_core_splits():
    """2 on dual-TensorCore chips (v7x), else 1 (v5e / v6e)."""
    try:
        kind = jax.devices()[0].device_kind.lower()
    except Exception:
        return 1
    return 2 if ("v7" in kind or "7x" in kind) else 1


def _accumulate(x_ref, wt_ref, acc_ref, *, mask_tail, f, tk, kb_total):
    """acc += x.float() @ W^T for the current K block (optionally tail-masked)."""
    x = x_ref[...].astype(jnp.float32)          # VMEM-local upcast == .float()
    w = wt_ref[...]
    if mask_tail:                               # static: last (ragged) K block only
        start = (kb_total - 1) * tk
        xcol = lax.broadcasted_iota(jnp.int32, x.shape, 1)
        x = jnp.where(start + xcol < f, x, 0.0)
        wcol = lax.broadcasted_iota(jnp.int32, w.shape, 1)
        w = jnp.where(start + wcol < f, w, 0.0)  # mask BOTH: 0 * garbage != 0
    acc_ref[...] += lax.dot_general(
        x, w, (((1,), (1,)), ((), ())),          # contract last dims -> (B, n_comp)
        preferred_element_type=jnp.float32)


def _fused_loss_kernel(x_ref, wt_ref, t_ref, loss_ref, acc_ref, *,
                       f, tk, kb_total, denom):
    """Single-TC path: grid=(kb_total,). Accumulate G in VMEM scratch and fuse
    the mean-L1 epilogue into the final K step (scalar loss -> SMEM)."""
    k = pl.program_id(0)

    @pl.when(k == 0)
    def _init():
        acc_ref[...] = jnp.zeros_like(acc_ref)

    acc = functools.partial(_accumulate, x_ref, wt_ref, acc_ref,
                            f=f, tk=tk, kb_total=kb_total)
    if f % tk != 0:
        @pl.when(k == kb_total - 1)
        def _tail():
            acc(mask_tail=True)

        @pl.when(k != kb_total - 1)
        def _body():
            acc(mask_tail=False)
    else:
        acc(mask_tail=False)

    @pl.when(k == kb_total - 1)
    def _epilogue():
        loss_ref[0] = jnp.sum(jnp.abs(acc_ref[...] - t_ref[...])) / denom


def _split_matmul_kernel(x_ref, wt_ref, o_ref, *, f, tk, kb_total, kb_per_core):
    """Dual-TC path: grid=(splits, kb_per_core); each core accumulates a
    partial (B, n_comp) G over its half of the K axis."""
    c = pl.program_id(0)
    k = pl.program_id(1)
    g_idx = c * kb_per_core + k

    @pl.when(k == 0)
    def _init():
        o_ref[...] = jnp.zeros_like(o_ref)

    acc = functools.partial(_accumulate, x_ref, wt_ref, o_ref,
                            f=f, tk=tk, kb_total=kb_total)
    if f % tk != 0:
        @pl.when(g_idx == kb_total - 1)        # real tail block only
        def _tail():
            acc(mask_tail=True)

        @pl.when(g_idx < kb_total - 1)
        def _body():
            acc(mask_tail=False)
    else:
        @pl.when(g_idx < kb_total)             # skip clamped/duplicated blocks
        def _body():
            acc(mask_tail=False)


def neural_interpolation_loss(x, w, target, *, tk=131072, splits=None):
    """loss = mean(|flatten(x).float() @ w - target|); returns (x, loss).

    x      : (B, C, H, W) image batch (any float dtype; streamed as-is)
    w      : (F, n_components) linear readout weights, F = C*H*W
    target : (B, n_components) precomputed interpolation target
    """
    b = x.shape[0]
    f = math.prod(x.shape[1:])
    n_comp = w.shape[1]
    assert w.shape[0] == f, (w.shape, f)

    x_flat = x.reshape(b, f)                    # native dtype, no HBM upcast
    # Lane-dense W layout (n_comp, F).  In a real training loop this transpose
    # is done once at module init, not per forward.
    w_t = jnp.asarray(w, jnp.float32).T
    t32 = jnp.asarray(target, jnp.float32)

    x_itemsize = jnp.dtype(x_flat.dtype).itemsize
    # Bytes per K column of the double-buffered streamed operands (padded).
    per_k = 2 * (_sublane_pad(b, x_itemsize) * x_itemsize
                 + _sublane_pad(n_comp, 4) * 4)
    max_tk = max(128, (VMEM_BUDGET_BYTES // per_k) // 128 * 128)
    tk_eff = max(128, min(_round_up(tk, 128), _round_up(f, 128), max_tk))
    kb_total = -(-f // tk_eff)                  # ceil-div
    denom = float(b * n_comp)

    if splits is None:
        splits = _num_core_splits()
    if kb_total < 2:
        splits = 1                              # nothing to shard

    cost = pl.CostEstimate(
        flops=2 * b * f * n_comp,
        transcendentals=0,
        bytes_accessed=b * f * x_itemsize + n_comp * f * 4 + b * n_comp * 4 + 4)
    vmem_limit = int(min(100 * 1024 * 1024,
                         max(16 * 1024 * 1024, per_k * tk_eff + (4 << 20))))

    if splits == 1:
        # Single pallas_call: matmul + fused mean-L1 epilogue (SMEM scalar out).
        kernel = functools.partial(_fused_loss_kernel, f=f, tk=tk_eff,
                                   kb_total=kb_total, denom=denom)
        loss = pl.pallas_call(
            kernel,
            out_shape=jax.ShapeDtypeStruct((1,), jnp.float32),
            grid_spec=pltpu.PrefetchScalarGridSpec(
                num_scalar_prefetch=0,
                grid=(kb_total,),
                in_specs=[
                    pl.BlockSpec((b, tk_eff), lambda k: (0, k)),
                    pl.BlockSpec((n_comp, tk_eff), lambda k: (0, k)),
                    pl.BlockSpec((b, n_comp), lambda k: (0, 0)),
                ],
                out_specs=pl.BlockSpec(memory_space=pltpu.MemorySpace.SMEM),
                scratch_shapes=[pltpu.VMEM((b, n_comp), jnp.float32)]),
            compiler_params=pltpu.CompilerParams(
                dimension_semantics=("arbitrary",),
                vmem_limit_bytes=vmem_limit),
            cost_estimate=cost,
        )(x_flat, w_t, t32)
        return x, loss[0]

    # Dual-TC path (v7x): split the K reduction across the two TensorCores.
    kb_per_core = -(-kb_total // splits)

    def kmap(c, k):                             # clamp so the DMA never reads OOB
        return jnp.minimum(c * kb_per_core + k, kb_total - 1)

    kernel = functools.partial(_split_matmul_kernel, f=f, tk=tk_eff,
                               kb_total=kb_total, kb_per_core=kb_per_core)
    partial_g = pl.pallas_call(
        kernel,
        out_shape=jax.ShapeDtypeStruct((splits, b, n_comp), jnp.float32),
        grid_spec=pltpu.PrefetchScalarGridSpec(
            num_scalar_prefetch=0,
            grid=(splits, kb_per_core),
            in_specs=[
                pl.BlockSpec((b, tk_eff), lambda c, k: (0, kmap(c, k))),
                pl.BlockSpec((n_comp, tk_eff), lambda c, k: (0, kmap(c, k))),
            ],
            out_specs=pl.BlockSpec((None, b, n_comp), lambda c, k: (c, 0, 0))),
        compiler_params=pltpu.CompilerParams(
            dimension_semantics=("parallel", "arbitrary"),
            vmem_limit_bytes=vmem_limit),
        cost_estimate=cost,
    )(x_flat, w_t)

    # The partial-G combine + mean-L1 is a ~20-element reduction: plain JAX
    # (XLA fuses it) is cheaper than a second Pallas launch.
    loss = jnp.mean(jnp.abs(jnp.sum(partial_g, axis=0) - t32))
    return x, loss


if __name__ == "__main__":
    key = jax.random.PRNGKey(0)
    k_w, k_r1, k_r2, k_x = jax.random.split(key, 4)

    # Small shapes consistent with the module's forward.
    B, C, H, W = 2, 4, 16, 16
    F = C * H * W                                  # 1024 flattened features

    # Deterministic synthetic "fit weights" (stand-in for the pickle load).
    # TODO(synk): load_fit_weights reads a pickle from disk; no Pallas/JAX
    # equivalent, so synthetic weights are used here.
    w = jax.random.normal(k_w, (F, N_COMPONENTS), jnp.float32) * 0.05

    # __init__ glue in plain JAX: image responses -> interpolation target.
    image1_response = jax.random.normal(k_r1, (B, F), jnp.float32)
    image2_response = jax.random.normal(k_r2, (B, F), jnp.float32)
    vec_mag = 0.5
    image1_resp = image1_response @ w
    image2_resp = image2_response @ w
    target = image1_resp + vec_mag * (image2_resp - image1_resp)

    # Forward input.
    x = jax.random.normal(k_x, (B, C, H, W), jnp.float32)

    def ref_loss(xx, ww, tt):
        g = xx.reshape(xx.shape[0], -1).astype(jnp.float32) @ ww
        return jnp.mean(jnp.abs(g - tt))

    # 1) Default path (auto core-split; whole F fits one K tile here).
    out, loss = neural_interpolation_loss(x, w, target)
    out, loss = jax.block_until_ready((out, loss))
    assert jnp.allclose(loss, ref_loss(x, w, target), rtol=1e-5, atol=1e-5), (
        loss, ref_loss(x, w, target))
    assert jnp.array_equal(out, x)

    # 2) Multi-block K with a ragged tail (exercises tail-only masking).
    C2, H2, W2 = 3, 10, 10                         # F2 = 300 (not /128)
    F2 = C2 * H2 * W2
    w2 = jax.random.normal(k_w, (F2, N_COMPONENTS), jnp.float32) * 0.05
    x2 = jax.random.normal(k_x, (B, C2, H2, W2), jnp.float32)
    t2 = jax.random.normal(k_r1, (B, N_COMPONENTS), jnp.float32)
    _, loss2 = neural_interpolation_loss(x2, w2, t2, tk=128, splits=1)
    loss2 = jax.block_until_ready(loss2)
    assert jnp.allclose(loss2, ref_loss(x2, w2, t2), rtol=1e-5, atol=1e-5), (
        loss2, ref_loss(x2, w2, t2))

    # 3) Dual-core split path (v7x layout; correct-but-sequential on 1-TC chips).
    _, loss3 = neural_interpolation_loss(x2, w2, t2, tk=128, splits=2)
    loss3 = jax.block_until_ready(loss3)
    assert jnp.allclose(loss3, ref_loss(x2, w2, t2), rtol=1e-5, atol=1e-5), (
        loss3, ref_loss(x2, w2, t2))

    print("KERNEL_OK")
</pallas_src>

<mosaic_0001>
module attributes {stable_mosaic.version = 11 : i64} {
  func.func @_fused_loss_kernel(%arg0: i32, %arg1: memref<2x1024xf32, #tpu.memory_space<vmem>>, %arg2: memref<5x1024xf32, #tpu.memory_space<vmem>>, %arg3: memref<2x5xf32, #tpu.memory_space<vmem>>, %arg4: memref<1xf32, #tpu.memory_space<smem>>, %arg5: memref<2x5xf32, #tpu.memory_space<vmem>>) attributes {dimension_semantics = [#tpu.dimension_semantics<arbitrary>], iteration_bounds = array<i64: 1>, scalar_prefetch = 0 : i64, scratch_operands = 1 : i64, tpu.core_type = #tpu.core_type<tc>, window_params = [{transform_indices = @transform_0, window_bounds = array<i64: 2, 1024>}, {transform_indices = @transform_1, window_bounds = array<i64: 5, 1024>}, {pipeline_mode = #tpu.pipeline_mode<synchronous>, transform_indices = @transform_2, window_bounds = array<i64: 2, 5>}, {transform_indices = @transform_3, window_bounds = array<i64: 1>}]} {
    %c0_i32 = arith.constant 0 : i32
    %0 = arith.cmpi eq, %arg0, %c0_i32 : i32
    %1 = arith.extui %0 : i1 to i32
    %c0_i32_0 = arith.constant 0 : i32
    %2 = arith.cmpi ne, %1, %c0_i32_0 : i32
    scf.if %2 {
      %cst_10 = arith.constant 0.000000e+00 : f32
      %12 = vector.broadcast %cst_10 : f32 to vector<2x5xf32>
      %c0_11 = arith.constant 0 : index
      %c0_12 = arith.constant 0 : index
      %13 = vector.load %arg5[%c0_11, %c0_12] : memref<2x5xf32, #tpu.memory_space<vmem>>, vector<2x5xf32>
      tpu.vector_store %arg5[%c0_11, %c0_12], %12 {strides = array<i32>} : memref<2x5xf32, #tpu.memory_space<vmem>>, vector<2x5xf32>,
    } else {
    }
    %c0 = arith.constant 0 : index
    %c0_1 = arith.constant 0 : index
    %3 = vector.load %arg1[%c0, %c0_1] : memref<2x1024xf32, #tpu.memory_space<vmem>>, vector<2x1024xf32>
    %c0_2 = arith.constant 0 : index
    %c0_3 = arith.constant 0 : index
    %4 = vector.load %arg2[%c0_2, %c0_3] : memref<5x1024xf32, #tpu.memory_space<vmem>>, vector<5x1024xf32>
    %c0_4 = arith.constant 0 : index
    %c0_5 = arith.constant 0 : index
    %5 = vector.load %arg5[%c0_4, %c0_5] : memref<2x5xf32, #tpu.memory_space<vmem>>, vector<2x5xf32>
    %cst = arith.constant dense<0.000000e+00> : vector<2x5xf32>
    %6 = tpu.matmul %3, %4, %cst {dimension_numbers = #tpu.dot_dimension_numbers<[1], [1], [0], [0], [0, 0, 1, 0], [], []>} : vector<2x1024xf32>, vector<5x1024xf32>, vector<2x5xf32> -> vector<2x5xf32>
    %7 = arith.addf %5, %6 : vector<2x5xf32>
    %c0_6 = arith.constant 0 : index
    %c0_7 = arith.constant 0 : index
    %8 = vector.load %arg5[%c0_6, %c0_7] : memref<2x5xf32, #tpu.memory_space<vmem>>, vector<2x5xf32>
    tpu.vector_store %arg5[%c0_6, %c0_7], %7 {strides = array<i32>} : memref<2x5xf32, #tpu.memory_space<vmem>>, vector<2x5xf32>,
    %c0_i32_8 = arith.constant 0 : i32
    %9 = arith.cmpi eq, %arg0, %c0_i32_8 : i32
    %10 = arith.extui %9 : i1 to i32
    %c0_i32_9 = arith.constant 0 : i32
    %11 = arith.cmpi ne, %10, %c0_i32_9 : i32
    scf.if %11 {
      %c0_10 = arith.constant 0 : index
      %c0_11 = arith.constant 0 : index
      %12 = vector.load %arg5[%c0_10, %c0_11] : memref<2x5xf32, #tpu.memory_space<vmem>>, vector<2x5xf32>
      %c0_12 = arith.constant 0 : index
      %c0_13 = arith.constant 0 : index
      %13 = vector.load %arg3[%c0_12, %c0_13] : memref<2x5xf32, #tpu.memory_space<vmem>>, vector<2x5xf32>
      %14 = arith.subf %12, %13 : vector<2x5xf32>
      %15 = math.absf %14 : vector<2x5xf32>
      %16 = vector.shape_cast %15 : vector<2x5xf32> to vector<1x2x5xf32>
      %cst_14 = arith.constant dense<0.000000e+00> : vector<1xf32>
      %17 = vector.multi_reduction <add>, %16, %cst_14 [1, 2] : vector<1x2x5xf32> to vector<1xf32>
      %18 = vector.shape_cast %17 : vector<1xf32> to vector<1x1x1xf32>
      %19 = vector.extract %18[0, 0, 0] : f32 from vector<1x1x1xf32>
      %cst_15 = arith.constant 1.000000e+01 : f32
      %20 = arith.divf %19, %cst_15 : f32
      %c0_16 = arith.constant 0 : index
      %21 = memref.load %arg4[%c0_16] : memref<1xf32, #tpu.memory_space<smem>>
      memref.store %20, %arg4[%c0_16] : memref<1xf32, #tpu.memory_space<smem>>
    } else {
    }
    return
  }
  func.func @transform_0(%arg0: i32) -> (i32, i32) {
    %c0_i32 = arith.constant 0 : i32
    %c0_i32_0 = arith.constant 0 : i32
    return %c0_i32, %arg0 : i32, i32
  }
  func.func @transform_1(%arg0: i32) -> (i32, i32) {
    %c0_i32 = arith.constant 0 : i32
    %c0_i32_0 = arith.constant 0 : i32
    return %c0_i32, %arg0 : i32, i32
  }
  func.func @transform_2(%arg0: i32) -> (i32, i32) {
    %c0_i32 = arith.constant 0 : i32
    %c0_i32_0 = arith.constant 0 : i32
    %c0_i32_1 = arith.constant 0 : i32
    return %c0_i32, %c0_i32_0 : i32, i32
  }
  func.func @transform_3(%arg0: i32) -> i32 {
    %c0_i32 = arith.constant 0 : i32
    %c0_i32_0 = arith.constant 0 : i32
    return %c0_i32 : i32
  }
}

</mosaic_0001>

<bundles_post_ra>
// kernel: tpu_custom_call.1
= control target key start
LH: loop header
LB: loop body
LE: loop exit
PB: predicated region body
PF: predicated region fallthrough
CT: control target
= control target key end

     0   :  { %8 = vsyncpa [#allocation4], 0  ;;  %s445_s0 = inlined_call_operand.hbm [shape: f32[2,1024], index: 0, kind: input, shape index: {}]   ;;  %s446_s1 = inlined_call_operand.hbm [shape: f32[5,1024], index: 1, kind: input, shape index: {}]   ;;  %s447_s2 = inlined_call_operand.hbm [shape: f32[2,5], index: 2, kind: input, shape index: {}]   ;;  %s448_s3 = inlined_call_operand.hbm [shape: f32[1], index: 3, kind: output, shape index: {}]  }
   0x1   :  { %9 = vsyncpa [#allocation7], 0  ;;  %s27_s14 = sshll.u32 %s446_s1, 4  ;;  %s28_s14 = int_to_ptr.hbm [resolvable:$true] %s27_s14 }
   0x2   :  { %10 = vsyncpa [#allocation5], 0  ;;  %s404_s15 = smov [#allocation6]   ;;  %s16_s19 = sshll.u32 %s445_s0, 4  ;;  %s17_s19 = int_to_ptr.hbm [resolvable:$true] %s16_s19 }
   0x3   :  { %s29_s16 = sshll.u32 %s404_s15, 4  ;;  %s405_s20 = smov [#allocation3]   ;;  %s30_s16 = int_to_ptr.vmem [resolvable:$true] %s29_s16 }
   0x4   :  { %32 = dma.hbm_to_vmem [thread:$0]  %s28_s14, 1024, %s30_s16, [#allocation7]  }
   0x5   :  { %s18_s21 = sshll.u32 %s405_s20, 4  ;;  %s38_s24 = sshll.u32 %s447_s2, 4  ;;  %s19_s21 = int_to_ptr.vmem [resolvable:$true] %s18_s21  ;;  %s39_s24 = int_to_ptr.hbm [resolvable:$true] %s38_s24 }
   0x6   :  { %21 = dma.hbm_to_vmem [thread:$0]  %s17_s19, 256, %s19_s21, [#allocation4]  }
   0x7   :  { %s406_s1 = smov [#allocation8]  }
   0x8   :  { %s40_s25 = sshll.u32 %s406_s1, 4  ;;  %s41_s25 = int_to_ptr.vmem [resolvable:$true] %s40_s25 }
   0x9   :  { %43 = dma.hbm_to_vmem [thread:$0]  %s39_s24, 32, %s41_s25, [#allocation7]  }
   0xa   :  { %398 = dma.done.wait [#allocation4], 256  }
   0xb   :  { %399 = vsyncadd [#allocation4], 4294967040 }
   0xc   :  { %400 = dma.done.wait [#allocation7], 1056  }
   0xd   :  { %401 = vsyncadd [#allocation7], 4294966240  ;;  %v66_v0 = vld [vmem:[#allocation6 + $0x10] sm:$0x1f]  ;;  %v64_v1 = vld [vmem:[#allocation6] sm:$0x1f] }
   0xe   :  { %v65_v2 = vld [vmem:[#allocation6 + $0x8] sm:$0x1f]  ;;  %149 = vmatpush.xpose.msra.mxu2 %v66_v0  ;;  %109 = vmatpush.xpose.msra.mxu0 %v64_v1  ;;  %v67_v3 = vld [vmem:[#allocation6 + $0x18] sm:$0x1f]  ;;  %v62_v4 = vld [vmem:[#allocation3] sm:$0xff]  ;;  %vm60_vm0 = vcmask 33792  }
   0xf   :  { %v70_v5 = vld [vmem:[#allocation6 + $0x30] sm:$0x1f]  ;;  %129 = vmatpush.xpose.msra.mxu1 %v65_v2  ;;  %169 = vmatpush.xpose.msra.mxu3 %v67_v3  ;;  %75 = vst [vmem:[#allocation1] ss:$4 sm:$0xff] %v62_v4  ;;  %v68_v6 = vld [vmem:[#allocation6 + $0x20] sm:$0x1f] }
  0x10   :  { %v71_v7 = vld [vmem:[#allocation6 + $0x38] sm:$0x1f]  ;;  %v69_v8 = vld [vmem:[#allocation6 + $0x28] sm:$0x1f]  ;;  %v407_v18 = vmov 0.0   ;;  %v408_v41 = vmov 10.0  }
  0x11   :  { %v63_v9 = vld [vmem:[#allocation3 + $0x8] sm:$0xff]  ;;  %61 = vst.msk [vmem:[#allocation2] sm:$0x3] %vm60_vm0, %v407_v18  ;;  %v261_v36 = vld [vmem:[#allocation8] sm:$0x3]  ;;  %312 = vrcp.f32 %v408_v41  ;;  %s290_s26 = sshll.u32 %s448_s3, 4  ;;  %s291_s26 = int_to_ptr.hbm [resolvable:$true] %s290_s26 }
  0x12   :  { %229 = vmatpush.xpose.msrb.mxu2 %v70_v5  ;;  %189 = vmatpush.xpose.msrb.mxu0 %v68_v6  ;;  %77 = vst [vmem:[#allocation1 + $0x20] ss:$4 sm:$0xff] %v63_v9  ;;  %s409_s30 = smov [#allocation9]  }
  0x13   :  { %249 = vmatpush.xpose.msrb.mxu3 %v71_v7  ;;  %209 = vmatpush.xpose.msrb.mxu1 %v69_v8 }
  0x16   :  { %v80_v10 = vld.sshfl [vmem:[#allocation1 + $0x10] sm:$0xff pattern:$0x73625140]  ;;  %v78_v11 = vld.sshfl [vmem:[#allocation1] sm:$0xff pattern:$0x73625140] }
  0x17   :  { %150 = vmatmul.f32.vlgmr.msra.gmra.mxu2 %v80_v10  ;;  %110 = vmatmul.f32.vlgmr.msra.gmra.mxu0 %v78_v11  ;;  %v79_v12 = vld.sshfl [vmem:[#allocation1 + $0x8] sm:$0xff pattern:$0x73625140]  ;;  %v81_v13 = vld.sshfl [vmem:[#allocation1 + $0x18] sm:$0xff pattern:$0x73625140]  ;;  %v313_v42 = vpop.eup %312 }
  0x18   :  { %130 = vmatmul.f32.vlgmr.msra.gmra.mxu1 %v79_v12  ;;  %170 = vmatmul.f32.vlgmr.msra.gmra.mxu3 %v81_v13  ;;  %v72_v33 = vld [vmem:[#allocation2] sm:$0x3]  ;;  %v275_v43 = vmul.f32 10.0, %v313_v42  ;;  %vm279_vm1 = vweird.f32 %v313_v42 }
  0x19   :  { %v84_v14 = vld.sshfl [vmem:[#allocation1 + $0x30] sm:$0xff pattern:$0x73625140]  ;;  %v82_v15 = vld.sshfl [vmem:[#allocation1 + $0x20] sm:$0xff pattern:$0x73625140] }
  0x1a   :  { %v85_v16 = vld.sshfl [vmem:[#allocation1 + $0x38] sm:$0xff pattern:$0x73625140]  ;;  %v83_v17 = vld.sshfl [vmem:[#allocation1 + $0x28] sm:$0xff pattern:$0x73625140] }
  0x1b   :  { %v276_v44 = vsub.f32 1.0, %v275_v43 }
  0x1d   :  { %v277_v48 = vmul.f32 %v313_v42, %v276_v44 }
  0x1f   :  { %230 = vmatmul.f32.vlgmr.msrb.gmra.mxu2 %v84_v14  ;;  %190 = vmatmul.f32.vlgmr.msrb.gmra.mxu0 %v82_v15  ;;  %v278_v51 = vadd.f32 %v313_v42, %v277_v48 }
  0x20   :  { %250 = vmatmul.f32.vlgmr.msrb.gmra.mxu3 %v85_v16  ;;  %210 = vmatmul.f32.vlgmr.msrb.gmra.mxu1 %v83_v17 }
  0x21   :  { %v280_v54 = vsel %vm279_vm1, %v313_v42, %v278_v51 }
  0x94   :  { %v111_v19 = vpop.f32.mrf.mxu0 }
  0x95   :  { %v131_v20 = vpop.f32.mrf.mxu1 }
  0x96   :  { %v132_v21 = vadd.f32 %v131_v20, %v111_v19 }
  0x9a   :  { %v151_v22 = vpop.f32.mrf.mxu2 }
  0x9b   :  { %v152_v23 = vadd.f32 %v151_v22, %v132_v21  ;;  %v171_v24 = vpop.f32.mrf.mxu3 }
  0x9c   :  { %v191_v25 = vpop.f32.mrf.mxu0 }
  0x9d   :  { %v172_v26 = vadd.f32 %v171_v24, %v152_v23  ;;  %v211_v27 = vpop.f32.mrf.mxu1 }
  0x9f   :  { %v192_v28 = vadd.f32 %v191_v25, %v172_v26 }
  0xa1   :  { %v212_v29 = vadd.f32 %v211_v27, %v192_v28 }
  0xa2   :  { %v231_v30 = vpop.f32.mrf.mxu2 }
  0xa3   :  { %v232_v31 = vadd.f32 %v231_v30, %v212_v29  ;;  %v251_v32 = vpop.f32.mrf.mxu3 }
  0xa5   :  { %v252_v34 = vadd.f32 %v251_v32, %v232_v31 }
  0xa7   :  { %v254_v35 = vadd.f32 %v252_v34, %v72_v33 }
  0xa9   :  { %256 = vst.msk [vmem:[#allocation2] sm:$0x3] %vm60_vm0, %v254_v35 }
  0xb0   :  { %v260_v37 = vld [vmem:[#allocation2] sm:$0x3] }
  0xb1   :  { %v262_v38 = vsub.f32 %v260_v37, %v261_v36 }
  0xb3   :  { %v263_v39 = vand.u32 2147483647, %v262_v38 }
  0xb5   :  { %v264_v40 = vsel %vm60_vm0, %v263_v39, 0.0 }
  0xb6   :  { %265 = vadd.xlane.f32.xlu0 %v264_v40 }
 0x129   :  { %v266_v45 = vpop.xlane.xlu0 %265 }
 0x12a   :  { %v267_v46 = vrot.slane %v266_v45, 4 }
 0x12c   :  { %v268_v47 = vadd.f32 %v267_v46, %v266_v45 }
 0x12e   :  { %v269_v49 = vrot.slane %v268_v47, 2 }
 0x130   :  { %v270_v50 = vadd.f32 %v269_v49, %v268_v47 }
 0x132   :  { %v271_v52 = vrot.slane %v270_v50, 1 }
 0x134   :  { %v272_v53 = vadd.f32 %v271_v52, %v270_v50 }
 0x136   :  { %302 = vpush %v272_v53 }
 0x137   :  { %304 = vpush %v280_v54 }
 0x167   :  { %s303_s27 = spop %302 }
 0x168   :  { %s305_s28 = spop %304 }
 0x169   :  { %s282_s29 = smul.f32 %s305_s28, %s303_s27 }
 0x16b   :  { %284 = sst [smem:[#allocation9]] %s282_s29 }
 0x16c   :  { %293 = dma.smem_to_hbm %s409_s30, 16, %s291_s26, [#allocation5]  }
 0x16d   :  { %402 = dma.done.wait [#allocation5], 16  }
 0x16e   :  { %403 = vsyncadd [#allocation5], 4294967280 }
 0x16f   :  { %298 = sfence }
 0x170   :  { %299 = vsyncpa [#allocation4], 1 }
 0x171   :  { %300 = vsyncpa [#allocation7], 1 }
 0x172   :  { %301 = vsyncpa [#allocation5], 1 }

</bundles_post_ra>
